<compile_context>
chip_gen: v7x
topology: tpu7x:2x2x1
jax: 0.10.0
libtpu: 0.0.40
codegen_flags: <defaults>
</compile_context>

<pallas_src>
import jax
import jax.numpy as jnp
import numpy as np
from jax.experimental import pallas as pl
from jax.experimental.pallas import tpu as pltpu

INPUT_DIM = 3      # Pendulum-v1 observation_space.shape[0]
HIDDEN_DIM = 128
OUTPUT_DIM = 1     # Pendulum-v1 action_space.shape[0]


def _policy_kernel(x_ref, w1_ref, b1_ref, w2_ref, b2_ref, w3_ref, b3_ref,
                   mean_ref):
    x = x_ref[...]                                           # (Bt, 3)
    w1 = w1_ref[...]                                         # (3, 128)

    # Layer 1 (K=3): VPU broadcast mul/adds instead of a 3/256-wide MXU pass.
    h1 = (x[:, 0:1] * w1[0:1, :]
          + x[:, 1:2] * w1[1:2, :]
          + x[:, 2:3] * w1[2:3, :]
          + b1_ref[...])
    h1 = jnp.maximum(h1, 0.0)                                # (Bt, 128)

    # Layer 2 (128x128): the one real MXU matmul, f32 accumulate.
    h2 = jnp.dot(h1, w2_ref[...], preferred_element_type=jnp.float32)
    h2 = jnp.maximum(h2 + b2_ref[...], 0.0)                  # (Bt, 128)

    # Layer 3 (128 -> 1): elementwise mul + cross-lane reduce (XLU slot),
    # avoids an N=1 MXU matmul + dependent pop on the critical path.
    mean = jnp.sum(h2 * w3_ref[...], axis=-1, keepdims=True) + b3_ref[0, 0]
    mean_ref[...] = mean                                     # (Bt, 1)


def policy_forward(state, params, *, b_tile=256):
    """state: (B, INPUT_DIM) f32.  Returns (mean (B, OUTPUT_DIM), std (OUTPUT_DIM,))."""
    w1, b1, w2, b2, w3, b3, log_std = params
    B = state.shape[0]

    # Batch tile: multiple of 8 (sublane), capped at b_tile; pad B up to it.
    tile = min(b_tile, max(8, ((B + 7) // 8) * 8))
    Bp = ((B + tile - 1) // tile) * tile
    if Bp != B:
        state = jnp.pad(state, ((0, Bp - B), (0, 0)))

    def const_spec(shape):
        # weights/biases: same block every grid step => fetched once, VMEM-resident
        return pl.BlockSpec(shape, lambda i: (0, 0))

    mean = pl.pallas_call(
        _policy_kernel,
        out_shape=jax.ShapeDtypeStruct((Bp, OUTPUT_DIM), jnp.float32),
        grid=(Bp // tile,),
        in_specs=[
            pl.BlockSpec((tile, INPUT_DIM), lambda i: (i, 0)),     # state
            const_spec((INPUT_DIM, HIDDEN_DIM)),                   # w1
            const_spec((1, HIDDEN_DIM)),                           # b1
            const_spec((HIDDEN_DIM, HIDDEN_DIM)),                  # w2
            const_spec((1, HIDDEN_DIM)),                           # b2
            const_spec((1, HIDDEN_DIM)),                           # w3 as a lane row
            pl.BlockSpec(memory_space=pltpu.MemorySpace.SMEM),     # b3 scalar
        ],
        out_specs=pl.BlockSpec((tile, OUTPUT_DIM), lambda i: (i, 0)),
        compiler_params=pltpu.CompilerParams(
            dimension_semantics=("parallel",)),                    # 2 TCs on v7x
    )(
        state,
        w1, b1.reshape(1, -1),
        w2, b2.reshape(1, -1),
        w3.reshape(1, -1),        # (128,1) column -> (1,128) lane row
        b3.reshape(1, 1),
    )

    # std is state-independent; no reason to burn a VMEM output + DMA on it.
    std = jnp.exp(log_std)
    return mean[:B], std


def init_params(key):
    """Deterministic init mimicking PyTorch Linear default (U(-1/sqrt(fan_in), +))."""
    ks = jax.random.split(key, 6)

    def linear(kw, kb, fan_in, fan_out):
        bound = 1.0 / np.sqrt(fan_in)
        # stored as [in, out] so kernel does x @ W
        w = jax.random.uniform(kw, (fan_in, fan_out), jnp.float32, -bound, bound)
        b = jax.random.uniform(kb, (fan_out,), jnp.float32, -bound, bound)
        return w, b

    w1, b1 = linear(ks[0], ks[1], INPUT_DIM, HIDDEN_DIM)
    w2, b2 = linear(ks[2], ks[3], HIDDEN_DIM, HIDDEN_DIM)
    w3, b3 = linear(ks[4], ks[5], HIDDEN_DIM, OUTPUT_DIM)
    log_std = jnp.zeros((OUTPUT_DIM,), jnp.float32)   # nn.Parameter(torch.zeros(output_dim))
    return (w1, b1, w2, b2, w3, b3, log_std)


def policy_forward_ref(state, params):
    w1, b1, w2, b2, w3, b3, log_std = params
    h1 = jnp.maximum(state @ w1 + b1, 0.0)
    h2 = jnp.maximum(h1 @ w2 + b2, 0.0)
    mean = h2 @ w3 + b3
    std = jnp.exp(log_std)
    return mean, std


if __name__ == "__main__":
    key = jax.random.PRNGKey(0)
    k_param, k_state = jax.random.split(key)

    params = init_params(k_param)
    B = 12                                   # not a multiple of 8: exercises the padded tail
    state = jax.random.normal(k_state, (B, INPUT_DIM), jnp.float32)

    mean, std = policy_forward(state, params)
    jax.block_until_ready((mean, std))

    mean_ref, std_ref = policy_forward_ref(state, params)
    np.testing.assert_allclose(np.asarray(mean), np.asarray(mean_ref), rtol=1e-5, atol=1e-5)
    np.testing.assert_allclose(np.asarray(std), np.asarray(std_ref), rtol=1e-6, atol=1e-6)

    assert mean.shape == (B, OUTPUT_DIM) and std.shape == (OUTPUT_DIM,)
    print("KERNEL_OK")
</pallas_src>

<mosaic_0001>
module attributes {stable_mosaic.version = 11 : i64} {
  func.func @_policy_kernel(%arg0: i32, %arg1: memref<16x3xf32, #tpu.memory_space<vmem>>, %arg2: memref<3x128xf32, #tpu.memory_space<vmem>>, %arg3: memref<1x128xf32, #tpu.memory_space<vmem>>, %arg4: memref<128x128xf32, #tpu.memory_space<vmem>>, %arg5: memref<1x128xf32, #tpu.memory_space<vmem>>, %arg6: memref<1x128xf32, #tpu.memory_space<vmem>>, %arg7: memref<1x1xf32, #tpu.memory_space<smem>>, %arg8: memref<16x1xf32, #tpu.memory_space<vmem>>) attributes {dimension_semantics = [#tpu.dimension_semantics<parallel>], iteration_bounds = array<i64: 1>, scalar_prefetch = 0 : i64, scratch_operands = 0 : i64, tpu.core_type = #tpu.core_type<tc>, window_params = [{transform_indices = @transform_0, window_bounds = array<i64: 16, 3>}, {pipeline_mode = #tpu.pipeline_mode<synchronous>, transform_indices = @transform_1, window_bounds = array<i64: 3, 128>}, {pipeline_mode = #tpu.pipeline_mode<synchronous>, transform_indices = @transform_2, window_bounds = array<i64: 1, 128>}, {pipeline_mode = #tpu.pipeline_mode<synchronous>, transform_indices = @transform_3, window_bounds = array<i64: 128, 128>}, {pipeline_mode = #tpu.pipeline_mode<synchronous>, transform_indices = @transform_4, window_bounds = array<i64: 1, 128>}, {pipeline_mode = #tpu.pipeline_mode<synchronous>, transform_indices = @transform_5, window_bounds = array<i64: 1, 128>}, {transform_indices = @transform_6, window_bounds = array<i64: 1, 1>}, {transform_indices = @transform_7, window_bounds = array<i64: 16, 1>}]} {
    %c0 = arith.constant 0 : index
    %c0_0 = arith.constant 0 : index
    %0 = vector.load %arg1[%c0, %c0_0] : memref<16x3xf32, #tpu.memory_space<vmem>>, vector<16x3xf32>
    %c0_1 = arith.constant 0 : index
    %c0_2 = arith.constant 0 : index
    %1 = vector.load %arg2[%c0_1, %c0_2] : memref<3x128xf32, #tpu.memory_space<vmem>>, vector<3x128xf32>
    %2 = vector.extract_strided_slice %0 {offsets = [0, 0], sizes = [16, 1], strides = [1, 1]} : vector<16x3xf32> to vector<16x1xf32>
    %3 = vector.extract_strided_slice %1 {offsets = [0, 0], sizes = [1, 128], strides = [1, 1]} : vector<3x128xf32> to vector<1x128xf32>
    %4 = vector.broadcast %2 : vector<16x1xf32> to vector<16x128xf32>
    %5 = vector.broadcast %3 : vector<1x128xf32> to vector<16x128xf32>
    %6 = arith.mulf %4, %5 : vector<16x128xf32>
    %7 = vector.extract_strided_slice %0 {offsets = [0, 1], sizes = [16, 1], strides = [1, 1]} : vector<16x3xf32> to vector<16x1xf32>
    %8 = vector.extract_strided_slice %1 {offsets = [1, 0], sizes = [1, 128], strides = [1, 1]} : vector<3x128xf32> to vector<1x128xf32>
    %9 = vector.broadcast %7 : vector<16x1xf32> to vector<16x128xf32>
    %10 = vector.broadcast %8 : vector<1x128xf32> to vector<16x128xf32>
    %11 = arith.mulf %9, %10 : vector<16x128xf32>
    %12 = arith.addf %6, %11 : vector<16x128xf32>
    %13 = vector.extract_strided_slice %0 {offsets = [0, 2], sizes = [16, 1], strides = [1, 1]} : vector<16x3xf32> to vector<16x1xf32>
    %14 = vector.extract_strided_slice %1 {offsets = [2, 0], sizes = [1, 128], strides = [1, 1]} : vector<3x128xf32> to vector<1x128xf32>
    %15 = vector.broadcast %13 : vector<16x1xf32> to vector<16x128xf32>
    %16 = vector.broadcast %14 : vector<1x128xf32> to vector<16x128xf32>
    %17 = arith.mulf %15, %16 : vector<16x128xf32>
    %18 = arith.addf %12, %17 : vector<16x128xf32>
    %c0_3 = arith.constant 0 : index
    %c0_4 = arith.constant 0 : index
    %19 = vector.load %arg3[%c0_3, %c0_4] : memref<1x128xf32, #tpu.memory_space<vmem>>, vector<1x128xf32>
    %20 = vector.broadcast %19 : vector<1x128xf32> to vector<16x128xf32>
    %21 = arith.addf %18, %20 : vector<16x128xf32>
    %cst = arith.constant 0.000000e+00 : f32
    %22 = vector.broadcast %cst : f32 to vector<16x128xf32>
    %23 = arith.maximumf %21, %22 : vector<16x128xf32>
    %c0_5 = arith.constant 0 : index
    %c0_6 = arith.constant 0 : index
    %24 = vector.load %arg4[%c0_5, %c0_6] : memref<128x128xf32, #tpu.memory_space<vmem>>, vector<128x128xf32>
    %cst_7 = arith.constant dense<0.000000e+00> : vector<16x128xf32>
    %25 = tpu.matmul %23, %24, %cst_7 {dimension_numbers = #tpu.dot_dimension_numbers<[1], [0], [0], [1], [0, 0, 1, 1], [], []>} : vector<16x128xf32>, vector<128x128xf32>, vector<16x128xf32> -> vector<16x128xf32>
    %c0_8 = arith.constant 0 : index
    %c0_9 = arith.constant 0 : index
    %26 = vector.load %arg5[%c0_8, %c0_9] : memref<1x128xf32, #tpu.memory_space<vmem>>, vector<1x128xf32>
    %27 = vector.broadcast %26 : vector<1x128xf32> to vector<16x128xf32>
    %28 = arith.addf %25, %27 : vector<16x128xf32>
    %cst_10 = arith.constant 0.000000e+00 : f32
    %29 = vector.broadcast %cst_10 : f32 to vector<16x128xf32>
    %30 = arith.maximumf %28, %29 : vector<16x128xf32>
    %c0_11 = arith.constant 0 : index
    %c0_12 = arith.constant 0 : index
    %31 = vector.load %arg6[%c0_11, %c0_12] : memref<1x128xf32, #tpu.memory_space<vmem>>, vector<1x128xf32>
    %32 = vector.broadcast %31 : vector<1x128xf32> to vector<16x128xf32>
    %33 = arith.mulf %30, %32 : vector<16x128xf32>
    %cst_13 = arith.constant dense<0.000000e+00> : vector<16xf32>
    %34 = vector.multi_reduction <add>, %33, %cst_13 [1] : vector<16x128xf32> to vector<16xf32>
    %35 = vector.shape_cast %34 : vector<16xf32> to vector<16x1xf32>
    %c0_14 = arith.constant 0 : index
    %c0_15 = arith.constant 0 : index
    %36 = memref.load %arg7[%c0_14, %c0_15] : memref<1x1xf32, #tpu.memory_space<smem>>
    %37 = vector.broadcast %36 : f32 to vector<16x1xf32>
    %38 = arith.addf %35, %37 : vector<16x1xf32>
    %c0_16 = arith.constant 0 : index
    %c0_17 = arith.constant 0 : index
    %39 = vector.load %arg8[%c0_16, %c0_17] : memref<16x1xf32, #tpu.memory_space<vmem>>, vector<16x1xf32>
    tpu.vector_store %arg8[%c0_16, %c0_17], %38 {strides = array<i32>} : memref<16x1xf32, #tpu.memory_space<vmem>>, vector<16x1xf32>,
    return
  }
  func.func @transform_0(%arg0: i32) -> (i32, i32) {
    %c0_i32 = arith.constant 0 : i32
    %c0_i32_0 = arith.constant 0 : i32
    return %arg0, %c0_i32 : i32, i32
  }
  func.func @transform_1(%arg0: i32) -> (i32, i32) {
    %c0_i32 = arith.constant 0 : i32
    %c0_i32_0 = arith.constant 0 : i32
    %c0_i32_1 = arith.constant 0 : i32
    return %c0_i32, %c0_i32_0 : i32, i32
  }
  func.func @transform_2(%arg0: i32) -> (i32, i32) {
    %c0_i32 = arith.constant 0 : i32
    %c0_i32_0 = arith.constant 0 : i32
    %c0_i32_1 = arith.constant 0 : i32
    return %c0_i32, %c0_i32_0 : i32, i32
  }
  func.func @transform_3(%arg0: i32) -> (i32, i32) {
    %c0_i32 = arith.constant 0 : i32
    %c0_i32_0 = arith.constant 0 : i32
    %c0_i32_1 = arith.constant 0 : i32
    return %c0_i32, %c0_i32_0 : i32, i32
  }
  func.func @transform_4(%arg0: i32) -> (i32, i32) {
    %c0_i32 = arith.constant 0 : i32
    %c0_i32_0 = arith.constant 0 : i32
    %c0_i32_1 = arith.constant 0 : i32
    return %c0_i32, %c0_i32_0 : i32, i32
  }
  func.func @transform_5(%arg0: i32) -> (i32, i32) {
    %c0_i32 = arith.constant 0 : i32
    %c0_i32_0 = arith.constant 0 : i32
    %c0_i32_1 = arith.constant 0 : i32
    return %c0_i32, %c0_i32_0 : i32, i32
  }
  func.func @transform_6(%arg0: i32) -> (i32, i32) {
    %c0_i32 = arith.constant 0 : i32
    %c0_i32_0 = arith.constant 0 : i32
    %c0_i32_1 = arith.constant 0 : i32
    return %c0_i32, %c0_i32_0 : i32, i32
  }
  func.func @transform_7(%arg0: i32) -> (i32, i32) {
    %c0_i32 = arith.constant 0 : i32
    %c0_i32_0 = arith.constant 0 : i32
    return %arg0, %c0_i32 : i32, i32
  }
}

</mosaic_0001>

<bundles_post_ra>
// kernel: tpu_custom_call.1
= control target key start
LH: loop header
LB: loop body
LE: loop exit
PB: predicated region body
PF: predicated region fallthrough
CT: control target
= control target key end

     0   :  { %13 = vsyncpa [#allocation4], 0  ;;  %s352_s24 = smov [#allocation3]   ;;  %s437_s0 = inlined_call_operand.vmem [shape: f32[16,3], index: 0, kind: input, shape index: {}]   ;;  %s438_s1 = inlined_call_operand.vmem [shape: f32[3,128], index: 1, kind: input, shape index: {}]   ;;  %s439_s2 = inlined_call_operand.vmem [shape: f32[1,128], index: 2, kind: input, shape index: {}]   ;;  %s440_s3 = inlined_call_operand.hbm [shape: f32[128,128], index: 3, kind: input, shape index: {}]   ;;  %s441_s4 = inlined_call_operand.vmem [shape: f32[1,128], index: 4, kind: input, shape index: {}]   ;;  %s442_s5 = inlined_call_operand.vmem [shape: f32[1,128], index: 5, kind: input, shape index: {}]   ;;  %s443_s6 = inlined_call_operand.<no memory space> [shape: f32[1,1], index: 6, kind: input, shape index: {}]   ;;  %s444_s7 = inlined_call_operand.vmem [shape: f32[16,1], index: 7, kind: output, shape index: {}]  }
   0x1   :  { %s25_s25 = sshll.u32 %s352_s24, 4  ;;  %s328_s28 = scalar_lea.hbm %s440_s3, 2048  ;;  %s26_s25 = int_to_ptr.vmem [resolvable:$true] %s25_s25 }
   0x2   :  { %p329_p0 = scmp.ne.s32.totalorder %s440_s3, %s328_s28  ;;  %p332_p1 = scmp.lt.u32.totalorder %s328_s28, %s440_s3 }
   0x4   :  { %p334_p2 = pnand %p332_p1, %p329_p0 }
   0x6   :  { %337 = shalt.err (!%p334_p2)
}
   0x7   :  { %s338_s10 = scalar_lea.vmem %s26_s25, 2048  ;;  %p343_p4 = scmp.lt.s32.totalorder %s26_s25, %s26_s25 }
   0x8   :  { %p339_p3 = scmp.ne.s32.totalorder %s26_s25, %s338_s10  ;;  %p344_p5 = scmp.lt.s32.totalorder %s338_s10, %s338_s10 }
   0xa   :  { %p345_p6 = por %p344_p5, %p343_p4 }
   0xc   :  { %p346_p7 = pnand %p345_p6, %p339_p3 }
   0xe   :  { %349 = shalt.err (!%p346_p7)
}
   0xf   :  { %s353_s11 = smov 128   ;;  %s354_s12 = smov 8  }
  0x10   :  { %31 = dma.hbm_to_vmem [thread:$0]  %s440_s3, 2048, %s26_s25, [#allocation4], %s353_s11, %s353_s11, %s354_s12  }
  0x11   :  { %350 = dma.done.wait [#allocation4], 2048  }
  0x12   :  { %351 = vsyncadd [#allocation4], 4294965248  ;;  %v355_v0 = vmov 0   ;;  %v42_v1 = vld [vmem:[%s437_s0 + $0x8] sm:$0xff]  ;;  %v41_v2 = vld [vmem:[%s437_s0] sm:$0xff]  ;;  %v356_v9 = vmov 1   ;;  %v54_v29 = vlaneseq }
  0x13   :  { %324 = vset.pattern.permute.xlu1 %v355_v0  ;;  %322 = vset.pattern.permute.xlu0 %v355_v0  ;;  %v103_v3 = vld [vmem:[#allocation3] sm:$0xff]  ;;  %v104_v4 = vld [vmem:[#allocation3 + $0x8] sm:$0xff]  ;;  %v105_v5 = vld [vmem:[#allocation3 + $0x10] sm:$0xff]  ;;  %v357_v13 = vmov 2   ;;  %vm220_vm0 = vcmask 7168  }
  0x14   :  { %51 = vperm.xlu1 %324, %v42_v1   ;;  %46 = vperm.xlu0 %322, %v41_v2   ;;  %v106_v6 = vld [vmem:[#allocation3 + $0x18] sm:$0xff]  ;;  %v284_v7 = vpack.c.bf16 %v104_v4, %v103_v3  ;;  %v107_v10 = vld [vmem:[#allocation3 + $0x20] sm:$0xff]  ;;  %v108_v11 = vld [vmem:[#allocation3 + $0x28] sm:$0xff]  ;;  %v55_v30 = vshrl.u32 %v54_v29, 7 }
  0x15   :  { %v288_v8 = vpack.c.bf16 %v106_v6, %v105_v5  ;;  %v292_v12 = vpack.c.bf16 %v108_v11, %v107_v10  ;;  %v109_v14 = vld [vmem:[#allocation3 + $0x30] sm:$0xff]  ;;  %v110_v15 = vld [vmem:[#allocation3 + $0x38] sm:$0xff]  ;;  %v111_v17 = vld [vmem:[#allocation3 + $0x40] sm:$0xff]  ;;  %v217_v5 = vstv %s443_s6 }
  0x16   :  { %285 = vmatprep.subr.bf16.mxu0 %v284_v7  ;;  %v296_v16 = vpack.c.bf16 %v110_v15, %v109_v14  ;;  %v112_v18 = vld [vmem:[#allocation3 + $0x48] sm:$0xff]  ;;  %v113_v20 = vld [vmem:[#allocation3 + $0x50] sm:$0xff]  ;;  %v114_v21 = vld [vmem:[#allocation3 + $0x58] sm:$0xff]  ;;  %v70_v31 = vsub.s32 1, %v55_v30  ;;  %v56_v34 = vsub.s32 0, %v55_v30  ;;  %v86_v37 = vsub.s32 2, %v55_v30 }
  0x17   :  { %287 = vmatpush3.bf16.msra.mxu0 %v284_v7  ;;  %v300_v19 = vpack.c.bf16 %v112_v18, %v111_v17  ;;  %v304_v22 = vpack.c.bf16 %v114_v21, %v113_v20  ;;  %v115_v23 = vld [vmem:[#allocation3 + $0x60] sm:$0xff]  ;;  %v116_v24 = vld [vmem:[#allocation3 + $0x68] sm:$0xff]  ;;  %v117_v26 = vld [vmem:[#allocation3 + $0x70] sm:$0xff] }
  0x18   :  { %325 = vset.pattern.permute.xlu1 %v356_v9  ;;  %323 = vset.pattern.permute.xlu0 %v356_v9  ;;  %v308_v25 = vpack.c.bf16 %v116_v24, %v115_v23  ;;  %v118_v27 = vld [vmem:[#allocation3 + $0x78] sm:$0xff]  ;;  %v43_v35 = vld [vmem:[%s438_s1] sm:$0x7] }
  0x19   :  { %65 = vperm.xlu1 %325, %v42_v1   ;;  %61 = vperm.xlu0 %323, %v41_v2   ;;  %v312_v28 = vpack.c.bf16 %v118_v27, %v117_v26  ;;  %v71_v36 = vrot.slane %v43_v35, %v70_v31  ;;  %v57_v38 = vrot.slane %v43_v35, %v56_v34  ;;  %v228_v52 = vld [vmem:[%s439_s2] ss:$0 sm:$0xff] }
  0x1a   :  { %289 = vmatprep.subr.bf16.mxu0 %v288_v8  ;;  %v87_v43 = vrot.slane %v43_v35, %v86_v37  ;;  %v229_v59 = vld [vmem:[%s441_s4] ss:$0 sm:$0xff] }
  0x1b   :  { %291 = vmatpush3.bf16.msra.mxu0 %v288_v8  ;;  %v230_v0 = vld [vmem:[%s442_s5] ss:$0 sm:$0xff] }
  0x1c   :  { %293 = vmatprep.subr.bf16.mxu0 %v292_v12 }
  0x1d   :  { %326 = vset.pattern.permute.xlu1 %v357_v13  ;;  %327 = vset.pattern.permute.xlu0 %v357_v13 }
  0x1e   :  { %77 = vperm.xlu1 %326, %v41_v2   ;;  %81 = vperm.xlu0 %327, %v42_v1  }
  0x1f   :  { %295 = vmatpush3.bf16.msra.mxu0 %v292_v12 }
  0x20   :  { %297 = vmatprep.subr.bf16.mxu0 %v296_v16 }
  0x23   :  { %299 = vmatpush3.bf16.msra.mxu0 %v296_v16 }
  0x24   :  { %301 = vmatprep.subr.bf16.mxu0 %v300_v19 }
  0x27   :  { %303 = vmatpush3.bf16.msra.mxu0 %v300_v19 }
  0x28   :  { %305 = vmatprep.subr.bf16.mxu0 %v304_v22 }
  0x2b   :  { %307 = vmatpush3.bf16.msra.mxu0 %v304_v22 }
  0x2c   :  { %309 = vmatprep.subr.bf16.mxu0 %v308_v25 }
  0x2f   :  { %311 = vmatpush3.bf16.msra.mxu0 %v308_v25 }
  0x30   :  { %313 = vmatprep.subr.bf16.mxu0 %v312_v28 }
  0x33   :  { %315 = vmatpush3.bf16.msra.mxu0 %v312_v28 }
  0x93   :  { %v52_v32 = vpop.permute.xlu1 %51  ;;  %v47_v33 = vpop.permute.xlu0 %46 }
  0x94   :  { %v59_v44 = vmul.f32 %v57_v38, %v52_v32  ;;  %v58_v45 = vmul.f32 %v57_v38, %v47_v33 }
  0x98   :  { %v66_v39 = vpop.permute.xlu1 %65  ;;  %v62_v40 = vpop.permute.xlu0 %61 }
  0x99   :  { %v73_v41 = vmul.f32 %v71_v36, %v66_v39  ;;  %v72_v42 = vmul.f32 %v71_v36, %v62_v40 }
  0x9b   :  { %v75_v48 = vadd.f32 %v73_v41, %v59_v44  ;;  %v74_v49 = vadd.f32 %v72_v42, %v58_v45 }
  0x9d   :  { %v78_v46 = vpop.permute.xlu1 %77  ;;  %v82_v47 = vpop.permute.xlu0 %81 }
  0x9e   :  { %v88_v50 = vmul.f32 %v87_v43, %v78_v46  ;;  %v89_v51 = vmul.f32 %v87_v43, %v82_v47 }
  0xa0   :  { %v91_v53 = vadd.f32 %v89_v51, %v75_v48  ;;  %v90_v54 = vadd.f32 %v88_v50, %v74_v49 }
  0xa2   :  { %v99_v55 = vadd.f32 %v228_v52, %v90_v54  ;;  %v100_v56 = vadd.f32 %v228_v52, %v91_v53 }
  0xa4   :  { %v101_v57 = vmax.f32 %v99_v55, 0.0  ;;  %v102_v58 = vmax.f32 %v100_v56, 0.0 }
  0xa6   :  { %281 = vmatprep.mubr.f32.mxu0 %v101_v57 }
  0xa7   :  { %282 = vmatmul.mubr.f32.vlgmr.msra.gmra.mrb[0].mxu0 %v102_v58 }
 0x17a   :  { %v283_v60 = vpop.f32.mrb[0].mxu0 }
 0x17b   :  { %v198_v61 = vadd.f32 %v283_v60, %v229_v59  ;;  %v192_v62 = vpop.f32.mrb[1].mxu0 }
 0x17c   :  { %v193_v63 = vadd.f32 %v229_v59, %v192_v62 }
 0x17d   :  { %v202_v1 = vmax.f32 %v198_v61, 0.0 }
 0x17e   :  { %v201_v2 = vmax.f32 %v193_v63, 0.0 }
 0x17f   :  { %v211_v3 = vmul.f32 %v230_v0, %v202_v1 }
 0x180   :  { %v210_v4 = vmul.f32 %v230_v0, %v201_v2 }
 0x181   :  { %214 = vadd.xlane.f32.xlu0 %v211_v3 }
 0x182   :  { %212 = vadd.xlane.f32.xlu1 %v210_v4 }
 0x20e   :  { %v215_v6 = vpop.xlane.xlu0 %214 }
 0x20f   :  { %v219_v7 = vadd.f32 %v217_v5, %v215_v6  ;;  %v213_v8 = vpop.xlane.xlu1 %212 }
 0x210   :  { %v218_v9 = vadd.f32 %v217_v5, %v213_v8 }
 0x211   :  { %222 = vst.msk [vmem:[%s444_s7 + $0x8] sm:$0xff] %vm220_vm0, %v219_v7 }
 0x212   :  { %221 = vst.msk [vmem:[%s444_s7] sm:$0xff] %vm220_vm0, %v218_v9 }
 0x213   :  { %227 = vsyncpa [#allocation4], 1 }

</bundles_post_ra>
